<compile_context>
chip_gen: v7x
topology: tpu7x:2x2x1
jax: 0.10.0
libtpu: 0.0.40
codegen_flags: <defaults>
</compile_context>

<pallas_src>
import functools

import jax
import jax.numpy as jnp
from jax.experimental import pallas as pl
from jax.experimental.pallas import tpu as pltpu


def _round_up(x, m):
    return ((x + m - 1) // m) * m


def _gnn_encoder_kernel(x_ref, wt_ref, b_ref, common_ref, private_ref, *, c_dim):
    # x_ref:  (tm, F)   streamed row tile of node features.
    # wt_ref: (F, C+P)  fused, pre-transposed weights (resident, index_map const).
    # b_ref:  (1, C+P)  fused bias (broadcast over sublanes).
    # common_ref: (tm, C), private_ref: (tm, P)  row-major output tiles.
    y = jnp.dot(x_ref[...], wt_ref[...], preferred_element_type=jnp.float32)
    y = y + b_ref[...]                                   # (tm, C+P), f32
    common_ref[...] = y[:, :c_dim].astype(common_ref.dtype)
    private_ref[...] = y[:, c_dim:].astype(private_ref.dtype)


def gnn_encoder_forward(x, adj, w_s, b_s, w_p, b_p, *, max_tm=16384):
    """Fused GNNEncoder forward.

    x:   (B, N, F) node features.       adj: unused (matches PyTorch forward).
    w_s: (c_dim, F), b_s: (c_dim,)      nn.Linear S (weight layout (out, in)).
    w_p: (p_dim, F), b_p: (p_dim,)      nn.Linear P.
    Returns (common (B, N, c_dim), private (B, N, p_dim)).
    """
    del adj  # adj is accepted but never used by the reference forward pass
    B, N, F = x.shape
    C = w_s.shape[0]
    P = w_p.shape[0]
    CP = C + P

    M = B * N
    x2 = x.reshape(M, F)

    # Large row tile (memory-bound: make per-step DMA >> 0.35us fixed cost),
    # multiple of 128, capped so the grid keeps >= ~4 steps when M allows
    # (megacore sharding on v7x).  VMEM working set at tm=16K is only a few MB.
    tm = min(max_tm, max(128, _round_up(pl.cdiv(M, 4), 128)))
    grid = pl.cdiv(M, tm)  # ragged tail -> Pallas edge blocks (no jnp.pad copy)

    # Fuse both projections; pre-transpose once in the wrapper (F x CP is tiny).
    w_t = jnp.concatenate([w_s, w_p], axis=0).T               # (F, CP)
    b_cat = jnp.concatenate([b_s, b_p], axis=0).reshape(1, CP)  # (1, CP)

    kernel = functools.partial(_gnn_encoder_kernel, c_dim=C)

    common2, private2 = pl.pallas_call(
        kernel,
        out_shape=(
            jax.ShapeDtypeStruct((M, C), x.dtype),
            jax.ShapeDtypeStruct((M, P), x.dtype),
        ),
        grid_spec=pltpu.PrefetchScalarGridSpec(
            num_scalar_prefetch=0,
            grid=(grid,),
            in_specs=[
                pl.BlockSpec((tm, F), lambda i: (i, 0)),   # x rows (streamed)
                pl.BlockSpec((F, CP), lambda i: (0, 0)),   # fused W^T (resident)
                pl.BlockSpec((1, CP), lambda i: (0, 0)),   # fused bias
            ],
            out_specs=[
                pl.BlockSpec((tm, C), lambda i: (i, 0)),   # common (row-major)
                pl.BlockSpec((tm, P), lambda i: (i, 0)),   # private (row-major)
            ],
        ),
        compiler_params=pltpu.CompilerParams(
            dimension_semantics=("parallel",),
            vmem_limit_bytes=32 * 1024 * 1024,
        ),
    )(x2, w_t, b_cat)

    common = common2.reshape(B, N, C)
    private = private2.reshape(B, N, P)
    return common, private


if __name__ == "__main__":
    key = jax.random.PRNGKey(0)

    def run_case(B, N, FT, C_DIM, P_DIM, case_key):
        kx, kadj, kws, kbs, kwp, kbp = jax.random.split(case_key, 6)
        x = jax.random.normal(kx, (B, N, FT), dtype=jnp.float32)
        adj = jax.random.normal(kadj, (B, N, N), dtype=jnp.float32)  # unused
        # nn.Linear shapes: weight (out, in), bias (out,)
        w_s = jax.random.normal(kws, (C_DIM, FT), dtype=jnp.float32) * 0.1
        b_s = jax.random.normal(kbs, (C_DIM,), dtype=jnp.float32) * 0.1
        w_p = jax.random.normal(kwp, (P_DIM, FT), dtype=jnp.float32) * 0.1
        b_p = jax.random.normal(kbp, (P_DIM,), dtype=jnp.float32) * 0.1

        common, private = gnn_encoder_forward(x, adj, w_s, b_s, w_p, b_p)
        jax.block_until_ready((common, private))

        ref_common = x @ w_s.T + b_s
        ref_private = x @ w_p.T + b_p
        assert common.shape == (B, N, C_DIM)
        assert private.shape == (B, N, P_DIM)
        assert jnp.allclose(common, ref_common, atol=1e-5, rtol=1e-5)
        assert jnp.allclose(private, ref_private, atol=1e-5, rtol=1e-5)

    k1, k2 = jax.random.split(key)
    # Small shape from the module spec (single, edge-masked grid step).
    run_case(2, 8, 32, 16, 8, k1)
    # Larger ragged row count: multi-step grid + masked tail tile, no pad copy.
    run_case(3, 400, 32, 16, 8, k2)

    print("KERNEL_OK")
</pallas_src>

<mosaic_0001>
module attributes {stable_mosaic.version = 11 : i64} {
  func.func @_gnn_encoder_kernel(%arg0: i32, %arg1: memref<128x32xf32, #tpu.memory_space<vmem>>, %arg2: memref<32x24xf32, #tpu.memory_space<vmem>>, %arg3: memref<1x24xf32, #tpu.memory_space<vmem>>, %arg4: memref<128x16xf32, #tpu.memory_space<vmem>>, %arg5: memref<128x8xf32, #tpu.memory_space<vmem>>) attributes {dimension_semantics = [#tpu.dimension_semantics<parallel>], iteration_bounds = array<i64: 1>, scalar_prefetch = 0 : i64, scratch_operands = 0 : i64, tpu.core_type = #tpu.core_type<tc>, window_params = [{transform_indices = @transform_0, window_bounds = array<i64: 128, 32>}, {pipeline_mode = #tpu.pipeline_mode<synchronous>, transform_indices = @transform_1, window_bounds = array<i64: 32, 24>}, {pipeline_mode = #tpu.pipeline_mode<synchronous>, transform_indices = @transform_2, window_bounds = array<i64: 1, 24>}, {transform_indices = @transform_3, window_bounds = array<i64: 128, 16>}, {transform_indices = @transform_4, window_bounds = array<i64: 128, 8>}]} {
    %c0 = arith.constant 0 : index
    %c0_0 = arith.constant 0 : index
    %0 = vector.load %arg1[%c0, %c0_0] : memref<128x32xf32, #tpu.memory_space<vmem>>, vector<128x32xf32>
    %c0_1 = arith.constant 0 : index
    %c0_2 = arith.constant 0 : index
    %1 = vector.load %arg2[%c0_1, %c0_2] : memref<32x24xf32, #tpu.memory_space<vmem>>, vector<32x24xf32>
    %cst = arith.constant dense<0.000000e+00> : vector<128x24xf32>
    %2 = tpu.matmul %0, %1, %cst {dimension_numbers = #tpu.dot_dimension_numbers<[1], [0], [0], [1], [0, 0, 1, 1], [], []>} : vector<128x32xf32>, vector<32x24xf32>, vector<128x24xf32> -> vector<128x24xf32>
    %c0_3 = arith.constant 0 : index
    %c0_4 = arith.constant 0 : index
    %3 = vector.load %arg3[%c0_3, %c0_4] : memref<1x24xf32, #tpu.memory_space<vmem>>, vector<1x24xf32>
    %4 = vector.broadcast %3 : vector<1x24xf32> to vector<128x24xf32>
    %5 = arith.addf %2, %4 : vector<128x24xf32>
    %6 = vector.extract_strided_slice %5 {offsets = [0, 0], sizes = [128, 16], strides = [1, 1]} : vector<128x24xf32> to vector<128x16xf32>
    %c0_5 = arith.constant 0 : index
    %c0_6 = arith.constant 0 : index
    %7 = vector.load %arg4[%c0_5, %c0_6] : memref<128x16xf32, #tpu.memory_space<vmem>>, vector<128x16xf32>
    tpu.vector_store %arg4[%c0_5, %c0_6], %6 {strides = array<i32>} : memref<128x16xf32, #tpu.memory_space<vmem>>, vector<128x16xf32>,
    %8 = vector.extract_strided_slice %5 {offsets = [0, 16], sizes = [128, 8], strides = [1, 1]} : vector<128x24xf32> to vector<128x8xf32>
    %c0_7 = arith.constant 0 : index
    %c0_8 = arith.constant 0 : index
    %9 = vector.load %arg5[%c0_7, %c0_8] : memref<128x8xf32, #tpu.memory_space<vmem>>, vector<128x8xf32>
    tpu.vector_store %arg5[%c0_7, %c0_8], %8 {strides = array<i32>} : memref<128x8xf32, #tpu.memory_space<vmem>>, vector<128x8xf32>,
    return
  }
  func.func @transform_0(%arg0: i32) -> (i32, i32) {
    %c0_i32 = arith.constant 0 : i32
    %c0_i32_0 = arith.constant 0 : i32
    return %arg0, %c0_i32 : i32, i32
  }
  func.func @transform_1(%arg0: i32) -> (i32, i32) {
    %c0_i32 = arith.constant 0 : i32
    %c0_i32_0 = arith.constant 0 : i32
    %c0_i32_1 = arith.constant 0 : i32
    return %c0_i32, %c0_i32_0 : i32, i32
  }
  func.func @transform_2(%arg0: i32) -> (i32, i32) {
    %c0_i32 = arith.constant 0 : i32
    %c0_i32_0 = arith.constant 0 : i32
    %c0_i32_1 = arith.constant 0 : i32
    return %c0_i32, %c0_i32_0 : i32, i32
  }
  func.func @transform_3(%arg0: i32) -> (i32, i32) {
    %c0_i32 = arith.constant 0 : i32
    %c0_i32_0 = arith.constant 0 : i32
    return %arg0, %c0_i32 : i32, i32
  }
  func.func @transform_4(%arg0: i32) -> (i32, i32) {
    %c0_i32 = arith.constant 0 : i32
    %c0_i32_0 = arith.constant 0 : i32
    return %arg0, %c0_i32 : i32, i32
  }
}

</mosaic_0001>

<bundles_post_ra>
// kernel: tpu_custom_call.1
= control target key start
LH: loop header
LB: loop body
LE: loop exit
PB: predicated region body
PF: predicated region fallthrough
CT: control target
= control target key end

     0   :  { %10 = vsyncpa [#allocation3], 0  ;;  %vm44_vm0 = vcmask 261120   ;;  %vm238_vm1 = vcmask 130048   ;;  %vm319_vm2 = vcmask 64512   ;;  %s663_s0 = inlined_call_operand.vmem [shape: f32[16,32], index: 0, kind: input, shape index: {}]   ;;  %s664_s1 = inlined_call_operand.vmem [shape: f32[32,24], index: 1, kind: input, shape index: {}]   ;;  %s665_s2 = inlined_call_operand.vmem [shape: f32[1,24], index: 2, kind: input, shape index: {}]   ;;  %s666_s3 = inlined_call_operand.hbm [shape: f32[16,16], index: 3, kind: output, shape index: {0}]   ;;  %s667_s4 = inlined_call_operand.vmem [shape: f32[16,8], index: 4, kind: output, shape index: {1}]  }
   0x1   :  { %v33_v0 = vld [vmem:[%s664_s1] sm:$0xff]  ;;  %v34_v1 = vld [vmem:[%s664_s1 + $0x8] sm:$0xff]  ;;  %v35_v3 = vld [vmem:[%s664_s1 + $0x10] sm:$0xff] }
   0x2   :  { %v465_v2 = vpack.c.bf16 %v34_v1, %v33_v0  ;;  %v36_v4 = vld [vmem:[%s664_s1 + $0x18] sm:$0xff]  ;;  %v17_v5 = vld [vmem:[%s663_s0] sm:$0xff]  ;;  %v18_v8 = vld [vmem:[%s663_s0 + $0x8] sm:$0xff] }
   0x3   :  { %v469_v6 = vpack.c.bf16 %v36_v4, %v35_v3  ;;  %441 = vmatprep.mubr.msk.f32.mxu0 %vm44_vm0, %v17_v5  ;;  %v25_v7 = vld [vmem:[%s663_s0 + $0x40] sm:$0xff]  ;;  %v26_v9 = vld [vmem:[%s663_s0 + $0x48] sm:$0xff]  ;;  %v19_v10 = vld [vmem:[%s663_s0 + $0x10] sm:$0xff] }
   0x4   :  { %466 = vmatprep.subr.bf16.mxu0 %v465_v2  ;;  %473 = vmatprep.subr.bf16.mxu1 %v465_v2  ;;  %v27_v11 = vld [vmem:[%s663_s0 + $0x50] sm:$0xff]  ;;  %v20_v12 = vld [vmem:[%s663_s0 + $0x18] sm:$0xff]  ;;  %v21_v14 = vld [vmem:[%s663_s0 + $0x20] sm:$0xff] }
   0x5   :  { %468 = vmatpush3.bf16.msra.mxu0 %v465_v2  ;;  %475 = vmatpush3.bf16.msra.mxu1 %v465_v2  ;;  %v28_v13 = vld [vmem:[%s663_s0 + $0x58] sm:$0xff]  ;;  %v29_v15 = vld [vmem:[%s663_s0 + $0x60] sm:$0xff]  ;;  %v22_v16 = vld [vmem:[%s663_s0 + $0x28] sm:$0xff] }
   0x6   :  { %470 = vmatprep.subr.bf16.mxu0 %v469_v6  ;;  %474 = vmatprep.subr.bf16.mxu1 %v469_v6  ;;  %v30_v17 = vld [vmem:[%s663_s0 + $0x68] sm:$0xff]  ;;  %v23_v18 = vld [vmem:[%s663_s0 + $0x30] sm:$0xff]  ;;  %v24_v20 = vld [vmem:[%s663_s0 + $0x38] sm:$0xff] }
   0x7   :  { %453 = vmatprep.mubr.msk.f32.mxu1 %vm44_vm0, %v25_v7  ;;  %v31_v19 = vld [vmem:[%s663_s0 + $0x70] sm:$0xff]  ;;  %v32_v21 = vld [vmem:[%s663_s0 + $0x78] sm:$0xff]  ;;  %v396_v22 = vld [vmem:[%s665_s2] ss:$0 sm:$0xff]  ;;  %s505_s0 = smov 112  }
   0x9   :  { %472 = vmatpush3.bf16.msra.mxu0 %v469_v6  ;;  %476 = vmatpush3.bf16.msra.mxu1 %v469_v6 }
   0xc   :  { %442 = vmatmul.mubr.msk.f32.vlgmr.msra.gmra.mrb[0].mxu0 %vm44_vm0, %v18_v8  ;;  %454 = vmatmul.mubr.msk.f32.vlgmr.msra.gmra.mrb[0].mxu1 %vm44_vm0, %v26_v9 }
   0xd   :  { %444 = vmatprep.mubr.msk.f32.mxu0 %vm44_vm0, %v19_v10  ;;  %456 = vmatprep.mubr.msk.f32.mxu1 %vm44_vm0, %v27_v11 }
  0x10   :  { %445 = vmatmul.mubr.msk.f32.gmra.mrb[2].mxu0 %vm44_vm0, %v20_v12  ;;  %457 = vmatmul.mubr.msk.f32.gmra.mrb[2].mxu1 %vm44_vm0, %v28_v13 }
  0x11   :  { %447 = vmatprep.mubr.msk.f32.mxu0 %vm44_vm0, %v21_v14  ;;  %459 = vmatprep.mubr.msk.f32.mxu1 %vm44_vm0, %v29_v15 }
  0x14   :  { %448 = vmatmul.mubr.msk.f32.gmra.mrb[4].mxu0 %vm44_vm0, %v22_v16  ;;  %460 = vmatmul.mubr.msk.f32.gmra.mrb[4].mxu1 %vm44_vm0, %v30_v17 }
  0x15   :  { %450 = vmatprep.mubr.msk.f32.mxu0 %vm44_vm0, %v23_v18  ;;  %462 = vmatprep.mubr.msk.f32.mxu1 %vm44_vm0, %v31_v19 }
  0x18   :  { %451 = vmatmul.mubr.msk.f32.gmra.mrb[6].mxu0 %vm44_vm0, %v24_v20  ;;  %463 = vmatmul.mubr.msk.f32.gmra.mrb[6].mxu1 %vm44_vm0, %v32_v21 }
  0xdf   :  { %v443_v23 = vpop.f32.mrb[0].mxu0  ;;  %v455_v24 = vpop.f32.mrb[0].mxu1 }
  0xe0   :  { %v165_v25 = vadd.f32 %v443_v23, %v396_v22  ;;  %v205_v26 = vadd.f32 %v455_v24, %v396_v22  ;;  %v159_v27 = vpop.f32.mrb[1].mxu0  ;;  %v199_v28 = vpop.f32.mrb[1].mxu1 }
  0xe1   :  { %v160_v29 = vadd.f32 %v396_v22, %v159_v27  ;;  %v200_v30 = vadd.f32 %v396_v22, %v199_v28 }
  0xe2   :  { %240 = vst.msk [vmem:[#allocation2 + $0x8] sm:$0xff] %vm238_vm1, %v165_v25  ;;  %248 = vst.msk [vmem:[#allocation2 + $0x48] sm:$0xff] %vm238_vm1, %v205_v26  ;;  %289 = vrot.lane.b32.xlu1 %v205_v26, %s505_s0  ;;  %273 = vrot.lane.b32.xlu0 %v165_v25, %s505_s0 }
  0xe3   :  { %239 = vst.msk [vmem:[#allocation2] sm:$0xff] %vm238_vm1, %v160_v29  ;;  %247 = vst.msk [vmem:[#allocation2 + $0x40] sm:$0xff] %vm238_vm1, %v200_v30  ;;  %v446_v31 = vpop.f32.mrb[2].mxu0  ;;  %v458_v32 = vpop.f32.mrb[2].mxu1 }
  0xe4   :  { %v175_v33 = vadd.f32 %v446_v31, %v396_v22  ;;  %v169_v34 = vpop.f32.mrb[3].mxu0  ;;  %v215_v35 = vadd.f32 %v458_v32, %v396_v22  ;;  %v209_v36 = vpop.f32.mrb[3].mxu1 }
  0xe5   :  { %v170_v37 = vadd.f32 %v396_v22, %v169_v34  ;;  %v210_v38 = vadd.f32 %v396_v22, %v209_v36 }
  0xe6   :  { %242 = vst.msk [vmem:[#allocation2 + $0x18] sm:$0xff] %vm238_vm1, %v175_v33  ;;  %250 = vst.msk [vmem:[#allocation2 + $0x58] sm:$0xff] %vm238_vm1, %v215_v35  ;;  %277 = vrot.lane.b32.xlu1 %v175_v33, %s505_s0  ;;  %271 = vrot.lane.b32.xlu0 %v160_v29, %s505_s0 }
  0xe7   :  { %241 = vst.msk [vmem:[#allocation2 + $0x10] sm:$0xff] %vm238_vm1, %v170_v37  ;;  %249 = vst.msk [vmem:[#allocation2 + $0x50] sm:$0xff] %vm238_vm1, %v210_v38  ;;  %v449_v39 = vpop.f32.mrb[4].mxu0  ;;  %v461_v40 = vpop.f32.mrb[4].mxu1 }
  0xe8   :  { %v185_v41 = vadd.f32 %v449_v39, %v396_v22  ;;  %v179_v42 = vpop.f32.mrb[5].mxu0  ;;  %v225_v43 = vadd.f32 %v461_v40, %v396_v22  ;;  %v219_v44 = vpop.f32.mrb[5].mxu1 }
  0xe9   :  { %v180_v45 = vadd.f32 %v396_v22, %v179_v42  ;;  %v220_v46 = vadd.f32 %v396_v22, %v219_v44 }
  0xea   :  { %293 = vrot.lane.b32.xlu1 %v215_v35, %s505_s0  ;;  %287 = vrot.lane.b32.xlu0 %v200_v30, %s505_s0  ;;  %244 = vst.msk [vmem:[#allocation2 + $0x28] sm:$0xff] %vm238_vm1, %v185_v41  ;;  %252 = vst.msk [vmem:[#allocation2 + $0x68] sm:$0xff] %vm238_vm1, %v225_v43 }
  0xeb   :  { %243 = vst.msk [vmem:[#allocation2 + $0x20] sm:$0xff] %vm238_vm1, %v180_v45  ;;  %251 = vst.msk [vmem:[#allocation2 + $0x60] sm:$0xff] %vm238_vm1, %v220_v46  ;;  %v452_v47 = vpop.f32.mrb[6].mxu0  ;;  %v464_v48 = vpop.f32.mrb[6].mxu1 }
  0xec   :  { %v195_v49 = vadd.f32 %v452_v47, %v396_v22  ;;  %v189_v50 = vpop.f32.mrb[7].mxu0  ;;  %v235_v51 = vadd.f32 %v464_v48, %v396_v22  ;;  %v229_v52 = vpop.f32.mrb[7].mxu1 }
  0xed   :  { %v190_v53 = vadd.f32 %v396_v22, %v189_v50  ;;  %v230_v54 = vadd.f32 %v396_v22, %v229_v52 }
  0xee   :  { %275 = vrot.lane.b32.xlu1 %v170_v37, %s505_s0  ;;  %291 = vrot.lane.b32.xlu0 %v210_v38, %s505_s0  ;;  %246 = vst.msk [vmem:[#allocation2 + $0x38] sm:$0xff] %vm238_vm1, %v195_v49  ;;  %254 = vst.msk [vmem:[#allocation2 + $0x78] sm:$0xff] %vm238_vm1, %v235_v51 }
  0xef   :  { %245 = vst.msk [vmem:[#allocation2 + $0x30] sm:$0xff] %vm238_vm1, %v190_v53  ;;  %253 = vst.msk [vmem:[#allocation2 + $0x70] sm:$0xff] %vm238_vm1, %v230_v54 }
  0xf2   :  { %281 = vrot.lane.b32.xlu1 %v185_v41, %s505_s0  ;;  %279 = vrot.lane.b32.xlu0 %v180_v45, %s505_s0 }
  0xf6   :  { %297 = vrot.lane.b32.xlu1 %v225_v43, %s505_s0  ;;  %295 = vrot.lane.b32.xlu0 %v220_v46, %s505_s0 }
  0xfa   :  { %285 = vrot.lane.b32.xlu1 %v195_v49, %s505_s0  ;;  %283 = vrot.lane.b32.xlu0 %v190_v53, %s505_s0 }
  0xfe   :  { %301 = vrot.lane.b32.xlu1 %v235_v51, %s505_s0  ;;  %299 = vrot.lane.b32.xlu0 %v230_v54, %s505_s0 }
 0x154   :  { %v290_v55 = vpop.permute.xlu1 %289  ;;  %v274_v56 = vpop.permute.xlu0 %273 }
 0x155   :  { %321 = vst.msk [vmem:[#allocation4 + $0x8] sm:$0xff] %vm319_vm2, %v274_v56 }
 0x158   :  { %v278_v57 = vpop.permute.xlu1 %277  ;;  %v272_v58 = vpop.permute.xlu0 %271 }
 0x159   :  { %320 = vst.msk [vmem:[#allocation4] sm:$0xff] %vm319_vm2, %v272_v58 }
 0x15c   :  { %v294_v59 = vpop.permute.xlu1 %293  ;;  %v288_v60 = vpop.permute.xlu0 %287 }
 0x160   :  { %v276_v61 = vpop.permute.xlu1 %275  ;;  %v292_v62 = vpop.permute.xlu0 %291 }
 0x164   :  { %v282_v63 = vpop.permute.xlu1 %281  ;;  %v280_v0 = vpop.permute.xlu0 %279 }
 0x168   :  { %v298_v1 = vpop.permute.xlu1 %297  ;;  %v296_v2 = vpop.permute.xlu0 %295 }
 0x16c   :  { %v286_v3 = vpop.permute.xlu1 %285  ;;  %v284_v4 = vpop.permute.xlu0 %283 }
 0x170   :  { %v302_v5 = vpop.permute.xlu1 %301  ;;  %v300_v6 = vpop.permute.xlu0 %299 }
 0x171   :  { %340 = vsyncadd [#allocation3], 1792  ;;  %v379_v7 = vld [vmem:[#allocation4] sm:$0xff]  ;;  %v381_v8 = vld [vmem:[#allocation4 + $0x8] sm:$0xff]  ;;  %s506_s2 = smov [#allocation2]  }
 0x172   :  { %s341_s29 = sshll.u32 %s506_s2, 4  ;;  %380 = vst [vmem:[%s667_s4] sm:$0xff] %v379_v7  ;;  %382 = vst [vmem:[%s667_s4 + $0x8] sm:$0xff] %v381_v8  ;;  %s342_s29 = int_to_ptr.vmem [resolvable:$true] %s341_s29 }
 0x173   :  { %s481_s8 = scalar_lea.vmem %s342_s29, 256  ;;  %s485_s9 = scalar_lea.vmem %s342_s29, 2048 }
 0x174   :  { %p482_p0 = scmp.ne.s32.totalorder %s342_s29, %s481_s8  ;;  %p486_p1 = scmp.lt.s32.totalorder %s342_s29, %s342_s29 }
 0x175   :  { %p487_p2 = scmp.lt.s32.totalorder %s485_s9, %s481_s8 }
 0x177   :  { %p488_p3 = por %p487_p2, %p486_p1 }
 0x179   :  { %p489_p4 = pnand %p488_p3, %p482_p0 }
 0x17b   :  { %492 = shalt.err (!%p489_p4)
}
 0x17c   :  { %s493_s12 = scalar_lea.hbm %s666_s3, 256 }
 0x17d   :  { %p494_p5 = scmp.ne.s32.totalorder %s666_s3, %s493_s12  ;;  %p497_p6 = scmp.lt.u32.totalorder %s493_s12, %s666_s3 }
 0x17f   :  { %p499_p7 = pnand %p497_p6, %p494_p5 }
 0x181   :  { %502 = shalt.err (!%p499_p7)
}
 0x182   :  { %s507_s4 = smov 128   ;;  %s508_s17 = smov 8  }
 0x183   :  { %347 = dma.vmem_to_hbm [thread:$0]  %s342_s29, 256, %s666_s3, [#allocation3], %s507_s4, %s507_s4, %s508_s17  }
 0x184   :  { %503 = dma.done.wait [#allocation3], 2048  }
 0x185   :  { %504 = vsyncadd [#allocation3], 4294965248 }
 0x186   :  { %391 = vsyncpa [#allocation3], 1 }

</bundles_post_ra>
